<compile_context>
chip_gen: v5e
topology: v5e:2x2
jax: 0.10.0
libtpu: 0.0.40
codegen_flags: <defaults>
</compile_context>

<pallas_src>
import jax
import jax.numpy as jnp
from jax.experimental import pallas as pl
from jax.experimental.pallas import tpu as pltpu


def _round_up(x, m):
    return ((x + m - 1) // m) * m


def _pad2(x, rows, cols):
    r, c = x.shape
    if (r, c) == (rows, cols):
        return x
    return jnp.pad(x, ((0, rows - r), (0, cols - c)))


# ----------------------------------------------------------------------------
# Kernels
# ----------------------------------------------------------------------------
def _make_fused_kernel(alpha, has_labels):
    """Single-shot kernel: whole (padded) feature dim in one block."""

    def kernel(*refs):
        if has_labels:
            feat_ref, means_ref, xx_ref, yy_ref, cls_ref, lbl_ref, out_ref = refs
        else:
            feat_ref, means_ref, xx_ref, yy_ref, out_ref = refs

        xy = jax.lax.dot_general(
            feat_ref[...], means_ref[...],
            dimension_numbers=(((1,), (1,)), ((), ())),
            preferred_element_type=jnp.float32,
        )                                                    # (tb, tc) f32
        neg = -0.5 * (xx_ref[...] - 2.0 * xy + yy_ref[...])  # (tb, tc)
        if has_labels:
            # neg * (1 + alpha*one_hot)  ==  neg + alpha*where(hit, neg, 0)
            hit = cls_ref[...] == lbl_ref[...]               # (1,tc) vs (tb,1)
            neg = neg + alpha * jnp.where(hit, neg, 0.0)
        out_ref[...] = neg

    return kernel


def _make_kacc_kernel(alpha, has_labels):
    """Fallback for very large feat_dim: accumulate over D chunks directly
    into the (resident) output block.  All program_id calls are at the top
    level of the kernel body (never inside a pl.when branch)."""

    def kernel(*refs):
        if has_labels:
            feat_ref, means_ref, xx_ref, yy_ref, cls_ref, lbl_ref, out_ref = refs
        else:
            feat_ref, means_ref, xx_ref, yy_ref, out_ref = refs

        k = pl.program_id(2)
        nk = pl.num_programs(2)

        @pl.when(k == 0)
        def _init():
            out_ref[...] = jnp.zeros_like(out_ref)

        out_ref[...] += jax.lax.dot_general(
            feat_ref[...], means_ref[...],
            dimension_numbers=(((1,), (1,)), ((), ())),
            preferred_element_type=jnp.float32,
        )

        @pl.when(k == nk - 1)
        def _finalize():
            acc = out_ref[...]
            neg = -0.5 * (xx_ref[...] - 2.0 * acc + yy_ref[...])
            if has_labels:
                hit = cls_ref[...] == lbl_ref[...]
                neg = neg + alpha * jnp.where(hit, neg, 0.0)
            out_ref[...] = neg

    return kernel


# ----------------------------------------------------------------------------
# Tiling selection (generation-aware, conservative for v7x's 64 MiB VMEM)
# ----------------------------------------------------------------------------
_VMEM_BLOCK_BUDGET = 36 * 1024 * 1024     # double-buffered block budget
_VMEM_LIMIT_CAP = 48 * 1024 * 1024        # <= 48 MiB keeps v7x happy


def _select_tiling(B, C, D, matmul_dtype, max_td=None):
    isz = jnp.dtype(matmul_dtype).itemsize
    b_align = 16 if isz == 2 else 8

    tb = min(256, _round_up(B, b_align))
    tc = min(512, _round_up(C, 128))
    d_pad0 = _round_up(D, 128)
    td = d_pad0 if max_td is None else min(_round_up(max_td, 128), d_pad0)

    def need(tb_, tc_, td_):
        # double-buffered matmul operands + output blocks + tiny side inputs
        return (2 * (tb_ + tc_) * td_ * isz
                + 2 * tb_ * tc_ * 4
                + 4 * (tb_ + tc_) * 4)

    while need(tb, tc, td) > _VMEM_BLOCK_BUDGET and tb > b_align:
        tb = max(b_align, tb // 2)
    while need(tb, tc, td) > _VMEM_BLOCK_BUDGET and tc > 128:
        tc = max(128, tc // 2)
    while need(tb, tc, td) > _VMEM_BLOCK_BUDGET and td > 128:
        td = max(128, _round_up(td // 2, 128))

    B_pad = _round_up(B, tb)
    C_pad = _round_up(C, tc)
    D_pad = _round_up(D, td)

    # v7x megacore: expose >= 2 output tiles along the parallel axes when we can.
    if (B_pad // tb) * (C_pad // tc) == 1 and tb >= 2 * b_align and (tb // 2) % b_align == 0:
        tb //= 2
        B_pad = _round_up(B, tb)

    vmem_need = need(tb, tc, td)
    return tb, tc, td, B_pad, C_pad, D_pad, vmem_need


# ----------------------------------------------------------------------------
# pallas_call driver
# ----------------------------------------------------------------------------
def _run_logits(feat_mm, means_mm, xx, yy, cls_ids, labels_p, *,
                alpha, tb, tc, td, vmem_need):
    B_pad, D_pad = feat_mm.shape
    C_pad = means_mm.shape[0]
    nb, nc, nk = B_pad // tb, C_pad // tc, D_pad // td
    has_labels = labels_p is not None
    fused = nk == 1

    inputs = [feat_mm, means_mm, xx, yy]
    if has_labels:
        inputs += [cls_ids, labels_p]

    if fused:
        # Grid (C tiles, B tiles): B innermost -> means block index changes only
        # at outer-loop boundaries, so means is DMA'd once per C tile (once total
        # in the common single-C-tile case) and stays VMEM-resident.
        grid = (nc, nb)
        in_specs = [
            pl.BlockSpec((tb, td), lambda c, b: (b, 0)),   # feat
            pl.BlockSpec((tc, td), lambda c, b: (c, 0)),   # means (resident)
            pl.BlockSpec((tb, 1), lambda c, b: (b, 0)),    # xx row norms
            pl.BlockSpec((1, tc), lambda c, b: (0, c)),    # yy center norms
        ]
        if has_labels:
            in_specs += [pl.BlockSpec((1, tc), lambda c, b: (0, c)),   # class ids
                         pl.BlockSpec((tb, 1), lambda c, b: (b, 0))]   # labels
        out_spec = pl.BlockSpec((tb, tc), lambda c, b: (b, c))
        sem = ("parallel", "parallel")
        kernel = _make_fused_kernel(float(alpha), has_labels)
    else:
        grid = (nc, nb, nk)
        in_specs = [
            pl.BlockSpec((tb, td), lambda c, b, k: (b, k)),
            pl.BlockSpec((tc, td), lambda c, b, k: (c, k)),
            pl.BlockSpec((tb, 1), lambda c, b, k: (b, 0)),
            pl.BlockSpec((1, tc), lambda c, b, k: (0, c)),
        ]
        if has_labels:
            in_specs += [pl.BlockSpec((1, tc), lambda c, b, k: (0, c)),
                         pl.BlockSpec((tb, 1), lambda c, b, k: (b, 0))]
        out_spec = pl.BlockSpec((tb, tc), lambda c, b, k: (b, c))
        sem = ("parallel", "parallel", "arbitrary")
        kernel = _make_kacc_kernel(float(alpha), has_labels)

    isz = jnp.dtype(feat_mm.dtype).itemsize
    cost = pl.CostEstimate(
        flops=2 * B_pad * C_pad * D_pad,
        transcendentals=0,
        bytes_accessed=(B_pad * D_pad + C_pad * D_pad) * isz + B_pad * C_pad * 4,
    )
    vmem_limit = int(min(_VMEM_LIMIT_CAP, max(2 * vmem_need, 32 * 1024 * 1024)))

    return pl.pallas_call(
        kernel,
        out_shape=jax.ShapeDtypeStruct((B_pad, C_pad), jnp.float32),
        grid_spec=pltpu.PrefetchScalarGridSpec(
            num_scalar_prefetch=0,
            grid=grid,
            in_specs=in_specs,
            out_specs=out_spec,
        ),
        compiler_params=pltpu.CompilerParams(
            dimension_semantics=sem,
            vmem_limit_bytes=vmem_limit,
        ),
        cost_estimate=cost,
    )(*inputs)


# ----------------------------------------------------------------------------
# LGMLoss forward (both branches: labels=None and labels given)
# ----------------------------------------------------------------------------
def lgm_loss_forward(
    feat,
    means,
    labels=None,
    *,
    alpha=0.1,
    lambda_=0.01,
    matmul_dtype=jnp.float32,   # jnp.bfloat16 on v5e/v6e/v7x when precision allows
    max_td=None,                # cap on the per-block feature chunk (testing / huge D)
):
    feat32 = feat.astype(jnp.float32)
    means32 = means.astype(jnp.float32)
    B, D = feat32.shape
    C = means32.shape[0]

    tb, tc, td, B_pad, C_pad, D_pad, vmem_need = _select_tiling(
        B, C, D, matmul_dtype, max_td
    )

    # Squared row norms computed ONCE on the unpadded f32 arrays; only the tiny
    # norm vectors get padded (zero-padding is harmless: padded rows/cols are
    # sliced off below).
    xx = _pad2(jnp.sum(feat32 * feat32, axis=1, keepdims=True), B_pad, 1)
    yy = _pad2(jnp.sum(means32 * means32, axis=1)[None, :], 1, C_pad)

    # Cast fused with pad; pads skipped entirely when already aligned.
    feat_mm = _pad2(feat32.astype(matmul_dtype), B_pad, D_pad)
    means_mm = _pad2(means32.astype(matmul_dtype), C_pad, D_pad)

    if labels is None:
        logits_p = _run_logits(feat_mm, means_mm, xx, yy, None, None,
                               alpha=0.0, tb=tb, tc=tc, td=td,
                               vmem_need=vmem_need)
        neg_sqr_dist = logits_p[:B, :C]
        # Regularizer fused out of a second kernel:
        #   y_i = argmax_c neg[i,c]  and  ||x_i - m_{y_i}||^2 == -2 * neg[i, y_i]
        # With y_i the argmax, the gathered value is simply the row max.
        # (Slice [:B,:C] BEFORE the max so padded class columns cannot win.)
        picked = jnp.max(neg_sqr_dist, axis=1)
        likelihood_reg_loss = -lambda_ * jnp.sum(picked) / B
        return neg_sqr_dist, likelihood_reg_loss, means32

    labels_i = labels.astype(jnp.int32)
    if B_pad != B:
        labels_p = jnp.pad(labels_i, (0, B_pad - B), constant_values=-1)
    else:
        labels_p = labels_i
    labels_p = labels_p.reshape(B_pad, 1)
    cls_ids = jnp.arange(C_pad, dtype=jnp.int32)[None, :]

    logits_p = _run_logits(feat_mm, means_mm, xx, yy, cls_ids, labels_p,
                           alpha=alpha, tb=tb, tc=tc, td=td,
                           vmem_need=vmem_need)
    logits_with_margin = logits_p[:B, :C]
    # The kernel scaled exactly the labeled column by (1+alpha); undo the margin
    # on the gathered column to recover the per-sample squared distances.
    picked = jnp.take_along_axis(logits_with_margin, labels_i[:, None], axis=1)[:, 0]
    picked = picked / (1.0 + alpha)
    likelihood_reg_loss = -lambda_ * jnp.sum(picked) / B
    return logits_with_margin, likelihood_reg_loss, means32


# ----------------------------------------------------------------------------
# Pure-JAX reference (mirrors the PyTorch forward) for a sanity check.
# ----------------------------------------------------------------------------
def _reference(feat, means, labels=None, *, alpha=0.1, lambda_=0.01):
    B = feat.shape[0]
    XY = feat @ means.T
    XX = jnp.sum(feat ** 2, axis=1, keepdims=True)
    YY = jnp.sum(means.T ** 2, axis=0, keepdims=True)
    neg = -0.5 * (XX - 2.0 * XY + YY)
    if labels is None:
        pl_ = jnp.argmax(neg, axis=1)
        mb = means[pl_]
        reg = lambda_ * (jnp.sum((feat - mb) ** 2) / 2) * (1.0 / B)
        return neg, reg, means
    ALPHA = jax.nn.one_hot(labels, means.shape[0], dtype=feat.dtype) * alpha
    K = ALPHA + 1.0
    logits = neg * K
    mb = means[labels]
    reg = lambda_ * (jnp.sum((feat - mb) ** 2) / 2) * (1.0 / B)
    return logits, reg, means


if __name__ == "__main__":
    num_classes = 4
    feat_dim = 32
    batch = 8
    alpha = 0.1
    lambda_ = 0.01

    key = jax.random.PRNGKey(0)
    k_feat, k_means, k_lbl, k_feat2, k_means2, k_lbl2 = jax.random.split(key, 6)

    # Deterministic "parameter" init: xavier_uniform with gain=sqrt(2)
    bound = (2.0 ** 0.5) * (6.0 / (num_classes + feat_dim)) ** 0.5
    means = jax.random.uniform(
        k_means, (num_classes, feat_dim), jnp.float32, minval=-bound, maxval=bound
    )
    feat = jax.random.normal(k_feat, (batch, feat_dim), jnp.float32)
    labels = jax.random.randint(k_lbl, (batch,), 0, num_classes, jnp.int32)

    # --- Fused single-shot kernel, f32 matmul, both branches -----------------
    logits, reg_loss, means_out = lgm_loss_forward(
        feat, means, labels, alpha=alpha, lambda_=lambda_
    )
    neg_sqr_dist, reg_loss_nl, _ = lgm_loss_forward(
        feat, means, None, alpha=alpha, lambda_=lambda_
    )
    jax.block_until_ready((logits, reg_loss, means_out, neg_sqr_dist, reg_loss_nl))

    ref_logits, ref_reg, _ = _reference(feat, means, labels, alpha=alpha, lambda_=lambda_)
    ref_neg, ref_reg_nl, _ = _reference(feat, means, None, alpha=alpha, lambda_=lambda_)
    assert jnp.allclose(logits, ref_logits, atol=1e-3, rtol=1e-4)
    assert jnp.allclose(reg_loss, ref_reg, atol=1e-4, rtol=1e-3)
    assert jnp.allclose(neg_sqr_dist, ref_neg, atol=1e-3, rtol=1e-4)
    assert jnp.allclose(reg_loss_nl, ref_reg_nl, atol=1e-4, rtol=1e-3)

    # --- bf16 matmul inputs (MXU-peak option), f32 accumulation --------------
    logits_bf16, reg_bf16, _ = lgm_loss_forward(
        feat, means, labels, alpha=alpha, lambda_=lambda_, matmul_dtype=jnp.bfloat16
    )
    jax.block_until_ready((logits_bf16, reg_bf16))
    assert jnp.allclose(logits_bf16, ref_logits, atol=0.25, rtol=0.05)
    assert jnp.allclose(reg_bf16, ref_reg, atol=5e-3, rtol=5e-2)

    # --- D-chunked accumulator fallback (forced via max_td) ------------------
    feat_dim2 = 160
    means2 = jax.random.normal(k_means2, (num_classes, feat_dim2), jnp.float32) * 0.3
    feat2 = jax.random.normal(k_feat2, (batch, feat_dim2), jnp.float32)
    labels2 = jax.random.randint(k_lbl2, (batch,), 0, num_classes, jnp.int32)

    logits2, reg2, _ = lgm_loss_forward(
        feat2, means2, labels2, alpha=alpha, lambda_=lambda_, max_td=128
    )
    neg2, reg2_nl, _ = lgm_loss_forward(
        feat2, means2, None, alpha=alpha, lambda_=lambda_, max_td=128
    )
    jax.block_until_ready((logits2, reg2, neg2, reg2_nl))

    ref_l2, ref_r2, _ = _reference(feat2, means2, labels2, alpha=alpha, lambda_=lambda_)
    ref_n2, ref_r2nl, _ = _reference(feat2, means2, None, alpha=alpha, lambda_=lambda_)
    assert jnp.allclose(logits2, ref_l2, atol=2e-3, rtol=1e-4)
    assert jnp.allclose(reg2, ref_r2, atol=1e-4, rtol=1e-3)
    assert jnp.allclose(neg2, ref_n2, atol=2e-3, rtol=1e-4)
    assert jnp.allclose(reg2_nl, ref_r2nl, atol=1e-4, rtol=1e-3)

    print("KERNEL_OK")
</pallas_src>

<mosaic_0001>
module attributes {stable_mosaic.version = 11 : i64} {
  func.func @kernel(%arg0: i32, %arg1: i32, %arg2: memref<8x128xf32, #tpu.memory_space<vmem>>, %arg3: memref<128x128xf32, #tpu.memory_space<vmem>>, %arg4: memref<8x1xf32, #tpu.memory_space<vmem>>, %arg5: memref<1x128xf32, #tpu.memory_space<vmem>>, %arg6: memref<1x128xi32, #tpu.memory_space<vmem>>, %arg7: memref<8x1xi32, #tpu.memory_space<vmem>>, %arg8: memref<8x128xf32, #tpu.memory_space<vmem>>) attributes {dimension_semantics = [#tpu.dimension_semantics<parallel>, #tpu.dimension_semantics<parallel>], iteration_bounds = array<i64: 1, 1>, scalar_prefetch = 0 : i64, scratch_operands = 0 : i64, tpu.core_type = #tpu.core_type<tc>, window_params = [{transform_indices = @transform_0, window_bounds = array<i64: 8, 128>}, {transform_indices = @transform_1, window_bounds = array<i64: 128, 128>}, {transform_indices = @transform_2, window_bounds = array<i64: 8, 1>}, {transform_indices = @transform_3, window_bounds = array<i64: 1, 128>}, {transform_indices = @transform_4, window_bounds = array<i64: 1, 128>}, {transform_indices = @transform_5, window_bounds = array<i64: 8, 1>}, {transform_indices = @transform_6, window_bounds = array<i64: 8, 128>}]} {
    %c0 = arith.constant 0 : index
    %c0_0 = arith.constant 0 : index
    %0 = vector.load %arg2[%c0, %c0_0] : memref<8x128xf32, #tpu.memory_space<vmem>>, vector<8x128xf32>
    %c0_1 = arith.constant 0 : index
    %c0_2 = arith.constant 0 : index
    %1 = vector.load %arg3[%c0_1, %c0_2] : memref<128x128xf32, #tpu.memory_space<vmem>>, vector<128x128xf32>
    %cst = arith.constant dense<0.000000e+00> : vector<8x128xf32>
    %2 = tpu.matmul %0, %1, %cst {dimension_numbers = #tpu.dot_dimension_numbers<[1], [1], [0], [0], [0, 0, 1, 0], [], []>} : vector<8x128xf32>, vector<128x128xf32>, vector<8x128xf32> -> vector<8x128xf32>
    %c0_3 = arith.constant 0 : index
    %c0_4 = arith.constant 0 : index
    %3 = vector.load %arg4[%c0_3, %c0_4] : memref<8x1xf32, #tpu.memory_space<vmem>>, vector<8x1xf32>
    %cst_5 = arith.constant 2.000000e+00 : f32
    %4 = vector.broadcast %cst_5 : f32 to vector<8x128xf32>
    %5 = arith.mulf %4, %2 : vector<8x128xf32>
    %6 = vector.broadcast %3 : vector<8x1xf32> to vector<8x128xf32>
    %7 = arith.subf %6, %5 : vector<8x128xf32>
    %c0_6 = arith.constant 0 : index
    %c0_7 = arith.constant 0 : index
    %8 = vector.load %arg5[%c0_6, %c0_7] : memref<1x128xf32, #tpu.memory_space<vmem>>, vector<1x128xf32>
    %9 = vector.broadcast %8 : vector<1x128xf32> to vector<8x128xf32>
    %10 = arith.addf %7, %9 : vector<8x128xf32>
    %cst_8 = arith.constant -5.000000e-01 : f32
    %11 = vector.broadcast %cst_8 : f32 to vector<8x128xf32>
    %12 = arith.mulf %11, %10 : vector<8x128xf32>
    %c0_9 = arith.constant 0 : index
    %c0_10 = arith.constant 0 : index
    %13 = vector.load %arg6[%c0_9, %c0_10] : memref<1x128xi32, #tpu.memory_space<vmem>>, vector<1x128xi32>
    %c0_11 = arith.constant 0 : index
    %c0_12 = arith.constant 0 : index
    %14 = vector.load %arg7[%c0_11, %c0_12] : memref<8x1xi32, #tpu.memory_space<vmem>>, vector<8x1xi32>
    %15 = vector.broadcast %13 : vector<1x128xi32> to vector<8x128xi32>
    %16 = vector.broadcast %14 : vector<8x1xi32> to vector<8x128xi32>
    %17 = arith.cmpi eq, %15, %16 : vector<8x128xi32>
    %cst_13 = arith.constant 0.000000e+00 : f32
    %18 = vector.broadcast %cst_13 : f32 to vector<8x128xf32>
    %19 = arith.select %17, %12, %18 : vector<8x128xi1>, vector<8x128xf32>
    %cst_14 = arith.constant 1.000000e-01 : f32
    %20 = vector.broadcast %cst_14 : f32 to vector<8x128xf32>
    %21 = arith.mulf %20, %19 : vector<8x128xf32>
    %22 = arith.addf %12, %21 : vector<8x128xf32>
    %c0_15 = arith.constant 0 : index
    %c0_16 = arith.constant 0 : index
    %23 = vector.load %arg8[%c0_15, %c0_16] : memref<8x128xf32, #tpu.memory_space<vmem>>, vector<8x128xf32>
    tpu.vector_store %arg8[%c0_15, %c0_16], %22 {strides = array<i32>} : memref<8x128xf32, #tpu.memory_space<vmem>>, vector<8x128xf32>,
    return
  }
  func.func @transform_0(%arg0: i32, %arg1: i32) -> (i32, i32) {
    %c0_i32 = arith.constant 0 : i32
    %c0_i32_0 = arith.constant 0 : i32
    return %arg1, %c0_i32 : i32, i32
  }
  func.func @transform_1(%arg0: i32, %arg1: i32) -> (i32, i32) {
    %c0_i32 = arith.constant 0 : i32
    %c0_i32_0 = arith.constant 0 : i32
    return %arg0, %c0_i32 : i32, i32
  }
  func.func @transform_2(%arg0: i32, %arg1: i32) -> (i32, i32) {
    %c0_i32 = arith.constant 0 : i32
    %c0_i32_0 = arith.constant 0 : i32
    return %arg1, %c0_i32 : i32, i32
  }
  func.func @transform_3(%arg0: i32, %arg1: i32) -> (i32, i32) {
    %c0_i32 = arith.constant 0 : i32
    %c0_i32_0 = arith.constant 0 : i32
    return %c0_i32, %arg0 : i32, i32
  }
  func.func @transform_4(%arg0: i32, %arg1: i32) -> (i32, i32) {
    %c0_i32 = arith.constant 0 : i32
    %c0_i32_0 = arith.constant 0 : i32
    return %c0_i32, %arg0 : i32, i32
  }
  func.func @transform_5(%arg0: i32, %arg1: i32) -> (i32, i32) {
    %c0_i32 = arith.constant 0 : i32
    %c0_i32_0 = arith.constant 0 : i32
    return %arg1, %c0_i32 : i32, i32
  }
  func.func @transform_6(%arg0: i32, %arg1: i32) -> (i32, i32) {
    %c0_i32 = arith.constant 0 : i32
    return %arg1, %arg0 : i32, i32
  }
}

</mosaic_0001>

<bundles_post_ra>
// kernel: tpu_custom_call.1
= control target key start
LH: loop header
LB: loop body
LE: loop exit
PB: predicated region body
PF: predicated region fallthrough
CT: control target
= control target key end

     0   :  { %11 = vsyncpa [#allocation3], 0  ;;  %s240_s0 = inlined_call_operand.vmem [shape: f32[8,128], index: 0, kind: input, shape index: {}]   ;;  %s241_s1 = inlined_call_operand.hbm [shape: f32[128,128], index: 1, kind: input, shape index: {}]   ;;  %s242_s2 = inlined_call_operand.vmem [shape: f32[8,1], index: 2, kind: input, shape index: {}]   ;;  %s243_s3 = inlined_call_operand.vmem [shape: f32[1,128], index: 3, kind: input, shape index: {}]   ;;  %s244_s4 = inlined_call_operand.vmem [shape: s32[1,128], index: 4, kind: input, shape index: {}]   ;;  %s245_s5 = inlined_call_operand.vmem [shape: s32[8,1], index: 5, kind: input, shape index: {}]   ;;  %s246_s6 = inlined_call_operand.hbm [shape: f32[8,128], index: 6, kind: output, shape index: {}]  }
   0x1   :  { %12 = vsyncpa [#allocation4], 0  ;;  %s19_s23 = sshll.u32 %s241_s1, 4  ;;  %s179_s24 = smov [#allocation2]   ;;  %s20_s23 = int_to_ptr.hbm [resolvable:$true] %s19_s23 }
   0x2   :  { %s21_s25 = sshll.u32 %s179_s24, 4  ;;  %s180_s26 = smov 128   ;;  %s22_s25 = int_to_ptr.vmem [resolvable:$true] %s21_s25 }
   0x3   :  { %s181_s27 = smov 8  }
   0x4   :  { %27 = dma.hbm_to_vmem [thread:$0]  %s20_s23, 2048, %s22_s25, [#allocation3], %s180_s26, %s180_s26, %s181_s27  }
   0x5   :  { %175 = dma.done.wait [#allocation3], 2048  }
   0x6   :  { %176 = vsyncadd [#allocation3], 4294965248  ;;  %v56_v0 = vld [vmem:[#allocation2 + $0x78] sm:$0xff]  ;;  %v55_v1 = vld [vmem:[#allocation2 + $0x70] sm:$0xff]  ;;  %v182_v10 = vmov 0   ;;  %s183_s11 = smov [#allocation5]  }
   0x7   :  { %57 = vmatpush.xpose.msra.mxu0 %v56_v0  ;;  %v54_v2 = vld [vmem:[#allocation2 + $0x68] sm:$0xff]  ;;  %v53_v3 = vld [vmem:[#allocation2 + $0x60] sm:$0xff]  ;;  %v52_v4 = vld [vmem:[#allocation2 + $0x58] sm:$0xff]  ;;  %124 = vset.pattern.permute.xlu0 %v182_v10  ;;  %s109_s14 = sshll.u32 %s246_s6, 4  ;;  %s110_s14 = int_to_ptr.hbm [resolvable:$true] %s109_s14 }
   0x8   :  { %v51_v5 = vld [vmem:[#allocation2 + $0x50] sm:$0xff]  ;;  %v50_v6 = vld [vmem:[#allocation2 + $0x48] sm:$0xff]  ;;  %v49_v7 = vld [vmem:[#allocation2 + $0x40] sm:$0xff] }
   0x9   :  { %v48_v8 = vld [vmem:[#allocation2 + $0x38] sm:$0xff]  ;;  %v77_v9 = vld [vmem:[%s242_s2] sm:$0xff]  ;;  %v47_v11 = vld [vmem:[#allocation2 + $0x30] sm:$0xff] }
   0xa   :  { %81 = vperm.xlu0 %124, %v77_v9   ;;  %v46_v12 = vld [vmem:[#allocation2 + $0x28] sm:$0xff]  ;;  %v92_v13 = vld [vmem:[%s245_s5] sm:$0xff]  ;;  %v44_v15 = vld [vmem:[#allocation2 + $0x18] sm:$0xff] }
   0xb   :  { %58 = vmatpush.xpose.msra.mxu0 %v55_v1  ;;  %v45_v14 = vld [vmem:[#allocation2 + $0x20] sm:$0xff]  ;;  %v43_v16 = vld [vmem:[#allocation2 + $0x10] sm:$0xff]  ;;  %v42_v17 = vld [vmem:[#allocation2 + $0x8] sm:$0xff] }
   0xc   :  { %v41_v18 = vld [vmem:[#allocation2] sm:$0xff] }
   0xd   :  { %v40_v19 = vld [vmem:[%s240_s0] sm:$0xff]  ;;  %s107_s0 = sshll.u32 %s183_s11, 4  ;;  %s108_s0 = int_to_ptr.vmem [resolvable:$true] %s107_s0 }
   0xe   :  { %v126_v23 = vld [vmem:[%s243_s3] ss:$0 sm:$0xff] }
   0xf   :  { %59 = vmatpush.xpose.msra.mxu0 %v54_v2  ;;  %v125_v25 = vld [vmem:[%s244_s4] ss:$0 sm:$0xff] }
  0x12   :  { %95 = vperm.xlu0 %124, %v92_v13  }
  0x13   :  { %60 = vmatpush.xpose.msra.mxu0 %v53_v3 }
  0x17   :  { %61 = vmatpush.xpose.msra.mxu0 %v52_v4 }
  0x1b   :  { %62 = vmatpush.xpose.msra.mxu0 %v51_v5 }
  0x1f   :  { %63 = vmatpush.xpose.msra.mxu0 %v50_v6 }
  0x23   :  { %64 = vmatpush.xpose.msra.mxu0 %v49_v7 }
  0x27   :  { %65 = vmatpush.xpose.msra.mxu0 %v48_v8 }
  0x2b   :  { %66 = vmatpush.xpose.msra.mxu0 %v47_v11 }
  0x2f   :  { %67 = vmatpush.xpose.msra.mxu0 %v46_v12 }
  0x33   :  { %68 = vmatpush.xpose.msra.mxu0 %v45_v14 }
  0x37   :  { %69 = vmatpush.xpose.msra.mxu0 %v44_v15 }
  0x3b   :  { %70 = vmatpush.xpose.msra.mxu0 %v43_v16 }
  0x3f   :  { %71 = vmatpush.xpose.msra.mxu0 %v42_v17 }
  0x43   :  { %72 = vmatpush.xpose.msra.mxu0 %v41_v18 }
  0x46   :  { %73 = vmatmul.f32.vlgmr.msra.gmra.mxu0 %v40_v19 }
  0x7c   :  { %v82_v20 = vpop.permute.xlu0 %81 }
  0x84   :  { %v96_v26 = vpop.permute.xlu0 %95 }
  0x85   :  { %vm97_vm0 = vcmp.eq.s32.totalorder %v125_v25, %v96_v26 }
  0xc3   :  { %v74_v21 = vpop.f32.mrf.mxu0 }
  0xc4   :  { %v78_v22 = vmul.f32 2.0, %v74_v21 }
  0xc6   :  { %v84_v24 = vsub.f32 %v82_v20, %v78_v22 }
  0xc8   :  { %v89_v27 = vadd.f32 %v126_v23, %v84_v24 }
  0xca   :  { %v90_v28 = vmul.f32 -0.5, %v89_v27 }
  0xcc   :  { %v98_v29 = vsel %vm97_vm0, %v90_v28, 0.0 }
  0xcd   :  { %v99_v30 = vmul.f32 0.1, %v98_v29 }
  0xcf   :  { %v100_v31 = vadd.f32 %v99_v30, %v90_v28 }
  0xd1   :  { %101 = vst [vmem:[#allocation5] sm:$0xff] %v100_v31 }
  0xd2   :  { %112 = dma.vmem_to_hbm [thread:$0]  %s108_s0, 128, %s110_s14, [#allocation4]  }
  0xd3   :  { %177 = dma.done.wait [#allocation4], 128  }
  0xd4   :  { %178 = vsyncadd [#allocation4], 4294967168 }
  0xd5   :  { %117 = vsyncpa [#allocation3], 1 }
  0xd6   :  { %118 = vsyncpa [#allocation4], 1 }

</bundles_post_ra>
